<compile_context>
chip_gen: v7x
topology: tpu7x:2x2x1
jax: 0.10.0
libtpu: 0.0.40
codegen_flags: <defaults>
</compile_context>

<pallas_src>
import jax
import jax.numpy as jnp
import numpy as np
from jax.experimental import pallas as pl
from jax.experimental.pallas import tpu as pltpu


def make_down_kernel(Hp, Wpp, Wp, Cp, Cout, bstep):
    P = Hp * Wpp  # flattened (width-padded) pixels per image, on the lane axis

    def conv3x3(x, w_ref, b_ref):
        # x: (C, P) f32 slab with zero columns at w in [Wp, Wpp).
        # 3x3 "same" conv as ONE im2col matmul: tap (dy,dx) is a static lane
        # shift of the whole slab; taps stack along sublanes (whole f32 vregs,
        # free), so no lane-misaligned patch construction remains.
        lane = jax.lax.broadcasted_iota(jnp.int32, x.shape, 1)
        taps = []
        for dy in range(3):
            for dx in range(3):
                off = (dy - 1) * Wpp + (dx - 1)
                t = x if off == 0 else jnp.roll(x, -off, axis=1)
                # Vertical halo: zero taps that wrap across the top/bottom
                # image edge.  The horizontal halo is handled by the zero
                # columns w in [Wp, Wpp).
                if dy == 0:
                    t = jnp.where(lane >= Wpp, t, 0.0)
                elif dy == 2:
                    t = jnp.where(lane < P - Wpp, t, 0.0)
                taps.append(t)
        patch = jnp.concatenate(taps, axis=0).astype(jnp.bfloat16)   # (9C, P)
        # BN scale is already folded into the bf16 weights (host side), so the
        # epilogue is just +bias then ReLU.  bf16 operands, f32 accumulation.
        acc = jnp.dot(w_ref[...], patch, preferred_element_type=jnp.float32)
        return jnp.maximum(acc + b_ref[...], 0.0)                    # (Cout, P)

    def kernel(x_ref, w1_ref, b1_ref, w2_ref, b2_ref, o_ref):
        col_ok = (jax.lax.broadcasted_iota(jnp.int32, (Cout, P), 1) % Wpp) < Wp
        for i in range(bstep):                 # bstep is 1 or B (tiny), unrolled
            # --- MaxPool2d(2): the 4 pooling-window taps live on block dims 1,2
            # (pooling is done on the bf16 DMA'd input; reference mirrors it).
            xp = jnp.maximum(jnp.maximum(x_ref[i, 0, 0], x_ref[i, 0, 1]),
                             jnp.maximum(x_ref[i, 1, 0], x_ref[i, 1, 1]))
            xp = xp.astype(jnp.float32)                              # (Cp, P)

            # --- Conv1 (3x3, pad=1) + folded BN + ReLU.  Re-zero the padded
            # columns (the bias makes them nonzero) so conv2's horizontal halo
            # stays correct.
            y = conv3x3(xp, w1_ref, b1_ref)
            y = jnp.where(col_ok, y, 0.0)

            # --- Conv2 (3x3, pad=1) + folded BN + ReLU.
            z = conv3x3(y, w2_ref, b2_ref)
            o_ref[i] = z.astype(o_ref.dtype)     # lane-dense (Cout, 128) bf16

    return kernel


def _fold_batch_into_one_step():
    """True on single-TensorCore chips (v5e / v6e): fold the whole batch into
    one grid step to amortize per-grid-step fixed cost.  v7x (2 TCs/chip) and
    unknown devices keep one image per step so the 'parallel' batch axis can
    be sharded across TensorCores."""
    try:
        kind = jax.devices()[0].device_kind.lower()
    except Exception:
        return False
    return any(t in kind for t in ("v5 lite", "v5e", "v6 lite", "v6e"))


def down_pallas(x_nchw, params):
    B, Cin, H, W = x_nchw.shape
    assert H % 2 == 0 and W % 2 == 0
    Hp, Wp = H // 2, W // 2
    Wpp = max(16, -(-(Wp + 1) // 8) * 8)      # >= Wp+1 zero cols, lane friendly
    P = Hp * Wpp
    Cout = params["w1"].shape[-1]
    Cp = -(-Cin // 8) * 8                     # pad input channels to sublane mult

    bstep = B if (_fold_batch_into_one_step() and B > 1) else 1

    # Glue (one fused XLA copy): NCHW f32 -> pooling-window-major,
    # channels-on-sublanes, width-padded flattened-pixels-on-lanes, bf16.
    xw = x_nchw.astype(jnp.bfloat16).reshape(B, Cin, Hp, 2, Wp, 2)
    xw = xw.transpose(0, 3, 5, 1, 2, 4)                    # (B,2,2,Cin,Hp,Wp)
    xw = jnp.pad(xw, ((0, 0), (0, 0), (0, 0),
                      (0, Cp - Cin), (0, 0), (0, Wpp - Wp)))
    x5 = xw.reshape(B, 2, 2, Cp, P)

    # Weights: fold the BN scale per output channel (in f32), pad input
    # channels, flatten to (Cout, 9*C) bf16 with K ordered (dy, dx, cin) to
    # match the tap-stacking order inside the kernel.
    def prep_w(w, s, cpad):
        wf = w * s[None, None, None, :]
        c = w.shape[2]
        wf = jnp.pad(wf, ((0, 0), (0, 0), (0, cpad - c), (0, 0)))
        return (wf.transpose(3, 0, 1, 2)
                  .reshape(w.shape[3], 9 * cpad).astype(jnp.bfloat16))

    w1k = prep_w(params["w1"], params["s1"], Cp)           # (Cout, 9*Cp)
    w2k = prep_w(params["w2"], params["s2"], Cout)         # (Cout, 9*Cout)
    b1k = params["b1"].reshape(Cout, 1).astype(jnp.float32)
    b2k = params["b2"].reshape(Cout, 1).astype(jnp.float32)

    kernel = make_down_kernel(Hp, Wpp, Wp, Cp, Cout, bstep)

    out = pl.pallas_call(
        kernel,
        out_shape=jax.ShapeDtypeStruct((B, Cout, P), jnp.bfloat16),
        grid_spec=pltpu.PrefetchScalarGridSpec(
            num_scalar_prefetch=0,
            grid=(B // bstep,),
            in_specs=[
                pl.BlockSpec((bstep, 2, 2, Cp, P), lambda g: (g, 0, 0, 0, 0)),
                pl.BlockSpec((Cout, 9 * Cp), lambda g: (0, 0)),
                pl.BlockSpec((Cout, 1), lambda g: (0, 0)),
                pl.BlockSpec((Cout, 9 * Cout), lambda g: (0, 0)),
                pl.BlockSpec((Cout, 1), lambda g: (0, 0)),
            ],
            out_specs=pl.BlockSpec((bstep, Cout, P), lambda g: (g, 0, 0)),
        ),
        compiler_params=pltpu.CompilerParams(
            dimension_semantics=("parallel",)),
    )(x5, w1k, b1k, w2k, b2k)

    # (B, Cout, Hp*Wpp) bf16 -> NCHW: reshape + slice only (no transpose).
    out = out.reshape(B, Cout, Hp, Wpp)[:, :, :, :Wp]
    return out.astype(jnp.float32)


def init_params(key, in_ch, out_ch, eps=1e-5):
    """Deterministic synthetic params. Conv weights stored HWIO; BatchNorm
    (eval mode) + conv bias folded into per-channel scale/bias."""
    ks = jax.random.split(key, 12)

    def bn_fold(kg, kb, km, kv, kc, ch):
        gamma = 1.0 + 0.1 * jax.random.normal(kg, (ch,), jnp.float32)
        beta = 0.1 * jax.random.normal(kb, (ch,), jnp.float32)
        run_mean = 0.1 * jax.random.normal(km, (ch,), jnp.float32)
        run_var = jnp.abs(jax.random.normal(kv, (ch,), jnp.float32)) + 0.5
        conv_bias = 0.1 * jax.random.normal(kc, (ch,), jnp.float32)
        s = gamma / jnp.sqrt(run_var + eps)
        b = beta + (conv_bias - run_mean) * s
        return s, b

    w1 = 0.2 * jax.random.normal(ks[0], (3, 3, in_ch, out_ch), jnp.float32)
    s1, b1 = bn_fold(ks[1], ks[2], ks[3], ks[4], ks[5], out_ch)
    w2 = 0.2 * jax.random.normal(ks[6], (3, 3, out_ch, out_ch), jnp.float32)
    s2, b2 = bn_fold(ks[7], ks[8], ks[9], ks[10], ks[11], out_ch)
    return dict(w1=w1, s1=s1, b1=b1, w2=w2, s2=s2, b2=b2)


def down_reference(x_nchw, p):
    """Pure-JAX (XLA) reference with the same numerics policy as the kernel:
    bf16 pooling, BN scale folded into bf16 conv weights, bf16 matmul operands
    with f32 accumulation, f32 bias+ReLU, intermediate activation rounded to
    bf16 (conv2 input) and the final activation rounded to bf16 (the kernel
    writes bf16 to HBM, the wrapper upcasts)."""
    B, Cin, H, W = x_nchw.shape
    Hp, Wp = H // 2, W // 2
    xp = (x_nchw.astype(jnp.bfloat16)
          .reshape(B, Cin, Hp, 2, Wp, 2).max(axis=(3, 5)))   # exact bf16 pool

    def block(x, w, s, b):
        wf = (w * s[None, None, None, :]).astype(jnp.bfloat16)  # same fold/round
        y = jax.lax.conv_general_dilated(
            x.astype(jnp.bfloat16), wf,
            window_strides=(1, 1), padding="SAME",
            dimension_numbers=("NCHW", "HWIO", "NCHW"),
            preferred_element_type=jnp.float32)
        return jnp.maximum(y + b[None, :, None, None], 0.0)

    y = block(xp, p["w1"], p["s1"], p["b1"])
    z = block(y, p["w2"], p["s2"], p["b2"])
    return z.astype(jnp.bfloat16).astype(jnp.float32)


if __name__ == "__main__":
    B, Cin, Cout, H, W = 2, 4, 8, 16, 16
    key = jax.random.PRNGKey(0)
    kx, kp = jax.random.split(key)

    x = jax.random.normal(kx, (B, Cin, H, W), jnp.float32)
    params = init_params(kp, Cin, Cout)

    out = down_pallas(x, params)
    out = jax.block_until_ready(out)

    ref = down_reference(x, params)
    assert out.shape == (B, Cout, H // 2, W // 2), out.shape
    # Both sides use bf16 MXU operands with f32 accumulation and identical
    # bf16 rounding points (folded weights, conv2 input, final output); the
    # remaining differences are f32 accumulation-order noise plus (rarely) a
    # 1-ULP bf16 flip of an intermediate activation, hence the loose 2e-2
    # tolerance (typical max |diff| is far smaller).
    np.testing.assert_allclose(np.asarray(out), np.asarray(ref),
                               rtol=2e-2, atol=2e-2)
    print("KERNEL_OK")
</pallas_src>

<mosaic_0001>
module attributes {stable_mosaic.version = 11 : i64} {
  func.func @kernel(%arg0: i32, %arg1: memref<1x2x2x8x128xbf16, #tpu.memory_space<vmem>>, %arg2: memref<8x72xbf16, #tpu.memory_space<vmem>>, %arg3: memref<8x1xf32, #tpu.memory_space<vmem>>, %arg4: memref<8x72xbf16, #tpu.memory_space<vmem>>, %arg5: memref<8x1xf32, #tpu.memory_space<vmem>>, %arg6: memref<1x8x128xbf16, #tpu.memory_space<vmem>>) attributes {dimension_semantics = [#tpu.dimension_semantics<parallel>], iteration_bounds = array<i64: 2>, scalar_prefetch = 0 : i64, scratch_operands = 0 : i64, tpu.core_type = #tpu.core_type<tc>, window_params = [{transform_indices = @transform_0, window_bounds = array<i64: 1, 2, 2, 8, 128>}, {pipeline_mode = #tpu.pipeline_mode<synchronous>, transform_indices = @transform_1, window_bounds = array<i64: 8, 72>}, {pipeline_mode = #tpu.pipeline_mode<synchronous>, transform_indices = @transform_2, window_bounds = array<i64: 8, 1>}, {pipeline_mode = #tpu.pipeline_mode<synchronous>, transform_indices = @transform_3, window_bounds = array<i64: 8, 72>}, {pipeline_mode = #tpu.pipeline_mode<synchronous>, transform_indices = @transform_4, window_bounds = array<i64: 8, 1>}, {transform_indices = @transform_5, window_bounds = array<i64: 1, 8, 128>}]} {
    %0 = tpu.iota {dimensions = array<i32: 1>} : vector<8x128xi32>
    %c16_i32 = arith.constant 16 : i32
    %c0_i32 = arith.constant 0 : i32
    %1 = arith.cmpi eq, %c16_i32, %c0_i32 : i32
    %c1_i32 = arith.constant 1 : i32
    %2 = arith.select %1, %c1_i32, %c16_i32 : i32
    %3 = vector.broadcast %2 : i32 to vector<8x128xi32>
    %4 = arith.remsi %0, %3 : vector<8x128xi32>
    %c0_i32_0 = arith.constant 0 : i32
    %5 = vector.broadcast %c0_i32_0 : i32 to vector<8x128xi32>
    %6 = arith.cmpi ne, %4, %5 : vector<8x128xi32>
    %c0_i32_1 = arith.constant 0 : i32
    %7 = vector.broadcast %c0_i32_1 : i32 to vector<8x128xi32>
    %8 = arith.cmpi slt, %4, %7 : vector<8x128xi32>
    %c0_i32_2 = arith.constant 0 : i32
    %9 = arith.cmpi slt, %2, %c0_i32_2 : i32
    %10 = vector.broadcast %9 : i1 to vector<8x128xi1>
    %11 = vector.broadcast %10 : vector<8x128xi1> to vector<8x128xi1>
    %12 = arith.xori %8, %11 : vector<8x128xi1>
    %13 = arith.andi %12, %6 : vector<8x128xi1>
    %14 = vector.broadcast %2 : i32 to vector<8x128xi32>
    %15 = arith.addi %4, %14 : vector<8x128xi32>
    %16 = arith.select %13, %15, %4 : vector<8x128xi1>, vector<8x128xi32>
    %c8_i32 = arith.constant 8 : i32
    %17 = vector.broadcast %c8_i32 : i32 to vector<8x128xi32>
    %18 = arith.cmpi slt, %16, %17 : vector<8x128xi32>
    %c0 = arith.constant 0 : index
    %c0_3 = arith.constant 0 : index
    %c0_4 = arith.constant 0 : index
    %c0_5 = arith.constant 0 : index
    %c0_6 = arith.constant 0 : index
    %19 = vector.load %arg1[%c0, %c0_3, %c0_4, %c0_5, %c0_6] : memref<1x2x2x8x128xbf16, #tpu.memory_space<vmem>>, vector<1x1x1x8x128xbf16>
    %20 = vector.shape_cast %19 : vector<1x1x1x8x128xbf16> to vector<8x128xbf16>
    %c0_7 = arith.constant 0 : index
    %c0_8 = arith.constant 0 : index
    %c1 = arith.constant 1 : index
    %c0_9 = arith.constant 0 : index
    %c0_10 = arith.constant 0 : index
    %21 = vector.load %arg1[%c0_7, %c0_8, %c1, %c0_9, %c0_10] : memref<1x2x2x8x128xbf16, #tpu.memory_space<vmem>>, vector<1x1x1x8x128xbf16>
    %22 = vector.shape_cast %21 : vector<1x1x1x8x128xbf16> to vector<8x128xbf16>
    %23 = arith.maximumf %20, %22 : vector<8x128xbf16>
    %c0_11 = arith.constant 0 : index
    %c1_12 = arith.constant 1 : index
    %c0_13 = arith.constant 0 : index
    %c0_14 = arith.constant 0 : index
    %c0_15 = arith.constant 0 : index
    %24 = vector.load %arg1[%c0_11, %c1_12, %c0_13, %c0_14, %c0_15] : memref<1x2x2x8x128xbf16, #tpu.memory_space<vmem>>, vector<1x1x1x8x128xbf16>
    %25 = vector.shape_cast %24 : vector<1x1x1x8x128xbf16> to vector<8x128xbf16>
    %c0_16 = arith.constant 0 : index
    %c1_17 = arith.constant 1 : index
    %c1_18 = arith.constant 1 : index
    %c0_19 = arith.constant 0 : index
    %c0_20 = arith.constant 0 : index
    %26 = vector.load %arg1[%c0_16, %c1_17, %c1_18, %c0_19, %c0_20] : memref<1x2x2x8x128xbf16, #tpu.memory_space<vmem>>, vector<1x1x1x8x128xbf16>
    %27 = vector.shape_cast %26 : vector<1x1x1x8x128xbf16> to vector<8x128xbf16>
    %28 = arith.maximumf %25, %27 : vector<8x128xbf16>
    %29 = arith.maximumf %23, %28 : vector<8x128xbf16>
    %30 = arith.extf %29 : vector<8x128xbf16> to vector<8x128xf32>
    %31 = tpu.iota {dimensions = array<i32: 1>} : vector<8x128xi32>
    %32 = vector.extract_strided_slice %30 {offsets = [0, 111], sizes = [8, 17], strides = [1, 1]} : vector<8x128xf32> to vector<8x17xf32>
    %33 = vector.extract_strided_slice %30 {offsets = [0, 0], sizes = [8, 111], strides = [1, 1]} : vector<8x128xf32> to vector<8x111xf32>
    %34 = tpu.concatenate %32, %33 in 1 : vector<8x17xf32>, vector<8x111xf32> -> vector<8x128xf32>
    %c16_i32_21 = arith.constant 16 : i32
    %35 = vector.broadcast %c16_i32_21 : i32 to vector<8x128xi32>
    %36 = arith.cmpi sge, %31, %35 : vector<8x128xi32>
    %cst = arith.constant 0.000000e+00 : f32
    %37 = vector.broadcast %cst : f32 to vector<8x128xf32>
    %38 = arith.select %36, %34, %37 : vector<8x128xi1>, vector<8x128xf32>
    %39 = vector.extract_strided_slice %30 {offsets = [0, 112], sizes = [8, 16], strides = [1, 1]} : vector<8x128xf32> to vector<8x16xf32>
    %40 = vector.extract_strided_slice %30 {offsets = [0, 0], sizes = [8, 112], strides = [1, 1]} : vector<8x128xf32> to vector<8x112xf32>
    %41 = tpu.concatenate %39, %40 in 1 : vector<8x16xf32>, vector<8x112xf32> -> vector<8x128xf32>
    %c16_i32_22 = arith.constant 16 : i32
    %42 = vector.broadcast %c16_i32_22 : i32 to vector<8x128xi32>
    %43 = arith.cmpi sge, %31, %42 : vector<8x128xi32>
    %cst_23 = arith.constant 0.000000e+00 : f32
    %44 = vector.broadcast %cst_23 : f32 to vector<8x128xf32>
    %45 = arith.select %43, %41, %44 : vector<8x128xi1>, vector<8x128xf32>
    %46 = vector.extract_strided_slice %30 {offsets = [0, 113], sizes = [8, 15], strides = [1, 1]} : vector<8x128xf32> to vector<8x15xf32>
    %47 = vector.extract_strided_slice %30 {offsets = [0, 0], sizes = [8, 113], strides = [1, 1]} : vector<8x128xf32> to vector<8x113xf32>
    %48 = tpu.concatenate %46, %47 in 1 : vector<8x15xf32>, vector<8x113xf32> -> vector<8x128xf32>
    %c16_i32_24 = arith.constant 16 : i32
    %49 = vector.broadcast %c16_i32_24 : i32 to vector<8x128xi32>
    %50 = arith.cmpi sge, %31, %49 : vector<8x128xi32>
    %cst_25 = arith.constant 0.000000e+00 : f32
    %51 = vector.broadcast %cst_25 : f32 to vector<8x128xf32>
    %52 = arith.select %50, %48, %51 : vector<8x128xi1>, vector<8x128xf32>
    %53 = vector.extract_strided_slice %30 {offsets = [0, 127], sizes = [8, 1], strides = [1, 1]} : vector<8x128xf32> to vector<8x1xf32>
    %54 = vector.extract_strided_slice %30 {offsets = [0, 0], sizes = [8, 127], strides = [1, 1]} : vector<8x128xf32> to vector<8x127xf32>
    %55 = tpu.concatenate %53, %54 in 1 : vector<8x1xf32>, vector<8x127xf32> -> vector<8x128xf32>
    %56 = vector.extract_strided_slice %30 {offsets = [0, 1], sizes = [8, 127], strides = [1, 1]} : vector<8x128xf32> to vector<8x127xf32>
    %57 = vector.extract_strided_slice %30 {offsets = [0, 0], sizes = [8, 1], strides = [1, 1]} : vector<8x128xf32> to vector<8x1xf32>
    %58 = tpu.concatenate %56, %57 in 1 : vector<8x127xf32>, vector<8x1xf32> -> vector<8x128xf32>
    %59 = vector.extract_strided_slice %30 {offsets = [0, 15], sizes = [8, 113], strides = [1, 1]} : vector<8x128xf32> to vector<8x113xf32>
    %60 = vector.extract_strided_slice %30 {offsets = [0, 0], sizes = [8, 15], strides = [1, 1]} : vector<8x128xf32> to vector<8x15xf32>
    %61 = tpu.concatenate %59, %60 in 1 : vector<8x113xf32>, vector<8x15xf32> -> vector<8x128xf32>
    %c112_i32 = arith.constant 112 : i32
    %62 = vector.broadcast %c112_i32 : i32 to vector<8x128xi32>
    %63 = arith.cmpi slt, %31, %62 : vector<8x128xi32>
    %cst_26 = arith.constant 0.000000e+00 : f32
    %64 = vector.broadcast %cst_26 : f32 to vector<8x128xf32>
    %65 = arith.select %63, %61, %64 : vector<8x128xi1>, vector<8x128xf32>
    %66 = vector.extract_strided_slice %30 {offsets = [0, 16], sizes = [8, 112], strides = [1, 1]} : vector<8x128xf32> to vector<8x112xf32>
    %67 = vector.extract_strided_slice %30 {offsets = [0, 0], sizes = [8, 16], strides = [1, 1]} : vector<8x128xf32> to vector<8x16xf32>
    %68 = tpu.concatenate %66, %67 in 1 : vector<8x112xf32>, vector<8x16xf32> -> vector<8x128xf32>
    %c112_i32_27 = arith.constant 112 : i32
    %69 = vector.broadcast %c112_i32_27 : i32 to vector<8x128xi32>
    %70 = arith.cmpi slt, %31, %69 : vector<8x128xi32>
    %cst_28 = arith.constant 0.000000e+00 : f32
    %71 = vector.broadcast %cst_28 : f32 to vector<8x128xf32>
    %72 = arith.select %70, %68, %71 : vector<8x128xi1>, vector<8x128xf32>
    %73 = vector.extract_strided_slice %30 {offsets = [0, 17], sizes = [8, 111], strides = [1, 1]} : vector<8x128xf32> to vector<8x111xf32>
    %74 = vector.extract_strided_slice %30 {offsets = [0, 0], sizes = [8, 17], strides = [1, 1]} : vector<8x128xf32> to vector<8x17xf32>
    %75 = tpu.concatenate %73, %74 in 1 : vector<8x111xf32>, vector<8x17xf32> -> vector<8x128xf32>
    %c112_i32_29 = arith.constant 112 : i32
    %76 = vector.broadcast %c112_i32_29 : i32 to vector<8x128xi32>
    %77 = arith.cmpi slt, %31, %76 : vector<8x128xi32>
    %cst_30 = arith.constant 0.000000e+00 : f32
    %78 = vector.broadcast %cst_30 : f32 to vector<8x128xf32>
    %79 = arith.select %77, %75, %78 : vector<8x128xi1>, vector<8x128xf32>
    %80 = tpu.concatenate %38, %45, %52, %55, %30, %58, %65, %72, %79 in 0 : vector<8x128xf32>, vector<8x128xf32>, vector<8x128xf32>, vector<8x128xf32>, vector<8x128xf32>, vector<8x128xf32>, vector<8x128xf32>, vector<8x128xf32>, vector<8x128xf32> -> vector<72x128xf32>
    %81 = arith.truncf %80 : vector<72x128xf32> to vector<72x128xbf16>
    %c0_31 = arith.constant 0 : index
    %c0_32 = arith.constant 0 : index
    %82 = vector.load %arg2[%c0_31, %c0_32] : memref<8x72xbf16, #tpu.memory_space<vmem>>, vector<8x72xbf16>
    %cst_33 = arith.constant dense<0.000000e+00> : vector<8x128xf32>
    %83 = tpu.matmul %82, %81, %cst_33 {dimension_numbers = #tpu.dot_dimension_numbers<[1], [0], [0], [1], [0, 0, 1, 1], [], []>} : vector<8x72xbf16>, vector<72x128xbf16>, vector<8x128xf32> -> vector<8x128xf32>
    %c0_34 = arith.constant 0 : index
    %c0_35 = arith.constant 0 : index
    %84 = vector.load %arg3[%c0_34, %c0_35] : memref<8x1xf32, #tpu.memory_space<vmem>>, vector<8x1xf32>
    %85 = vector.broadcast %84 : vector<8x1xf32> to vector<8x128xf32>
    %86 = arith.addf %83, %85 : vector<8x128xf32>
    %cst_36 = arith.constant 0.000000e+00 : f32
    %87 = vector.broadcast %cst_36 : f32 to vector<8x128xf32>
    %88 = arith.maximumf %86, %87 : vector<8x128xf32>
    %cst_37 = arith.constant 0.000000e+00 : f32
    %89 = vector.broadcast %cst_37 : f32 to vector<8x128xf32>
    %90 = arith.select %18, %88, %89 : vector<8x128xi1>, vector<8x128xf32>
    %91 = tpu.iota {dimensions = array<i32: 1>} : vector<8x128xi32>
    %92 = vector.extract_strided_slice %90 {offsets = [0, 111], sizes = [8, 17], strides = [1, 1]} : vector<8x128xf32> to vector<8x17xf32>
    %93 = vector.extract_strided_slice %90 {offsets = [0, 0], sizes = [8, 111], strides = [1, 1]} : vector<8x128xf32> to vector<8x111xf32>
    %94 = tpu.concatenate %92, %93 in 1 : vector<8x17xf32>, vector<8x111xf32> -> vector<8x128xf32>
    %c16_i32_38 = arith.constant 16 : i32
    %95 = vector.broadcast %c16_i32_38 : i32 to vector<8x128xi32>
    %96 = arith.cmpi sge, %91, %95 : vector<8x128xi32>
    %cst_39 = arith.constant 0.000000e+00 : f32
    %97 = vector.broadcast %cst_39 : f32 to vector<8x128xf32>
    %98 = arith.select %96, %94, %97 : vector<8x128xi1>, vector<8x128xf32>
    %99 = vector.extract_strided_slice %90 {offsets = [0, 112], sizes = [8, 16], strides = [1, 1]} : vector<8x128xf32> to vector<8x16xf32>
    %100 = vector.extract_strided_slice %90 {offsets = [0, 0], sizes = [8, 112], strides = [1, 1]} : vector<8x128xf32> to vector<8x112xf32>
    %101 = tpu.concatenate %99, %100 in 1 : vector<8x16xf32>, vector<8x112xf32> -> vector<8x128xf32>
    %c16_i32_40 = arith.constant 16 : i32
    %102 = vector.broadcast %c16_i32_40 : i32 to vector<8x128xi32>
    %103 = arith.cmpi sge, %91, %102 : vector<8x128xi32>
    %cst_41 = arith.constant 0.000000e+00 : f32
    %104 = vector.broadcast %cst_41 : f32 to vector<8x128xf32>
    %105 = arith.select %103, %101, %104 : vector<8x128xi1>, vector<8x128xf32>
    %106 = vector.extract_strided_slice %90 {offsets = [0, 113], sizes = [8, 15], strides = [1, 1]} : vector<8x128xf32> to vector<8x15xf32>
    %107 = vector.extract_strided_slice %90 {offsets = [0, 0], sizes = [8, 113], strides = [1, 1]} : vector<8x128xf32> to vector<8x113xf32>
    %108 = tpu.concatenate %106, %107 in 1 : vector<8x15xf32>, vector<8x113xf32> -> vector<8x128xf32>
    %c16_i32_42 = arith.constant 16 : i32
    %109 = vector.broadcast %c16_i32_42 : i32 to vector<8x128xi32>
    %110 = arith.cmpi sge, %91, %109 : vector<8x128xi32>
    %cst_43 = arith.constant 0.000000e+00 : f32
    %111 = vector.broadcast %cst_43 : f32 to vector<8x128xf32>
    %112 = arith.select %110, %108, %111 : vector<8x128xi1>, vector<8x128xf32>
    %113 = vector.extract_strided_slice %90 {offsets = [0, 127], sizes = [8, 1], strides = [1, 1]} : vector<8x128xf32> to vector<8x1xf32>
    %114 = vector.extract_strided_slice %90 {offsets = [0, 0], sizes = [8, 127], strides = [1, 1]} : vector<8x128xf32> to vector<8x127xf32>
    %115 = tpu.concatenate %113, %114 in 1 : vector<8x1xf32>, vector<8x127xf32> -> vector<8x128xf32>
    %116 = vector.extract_strided_slice %90 {offsets = [0, 1], sizes = [8, 127], strides = [1, 1]} : vector<8x128xf32> to vector<8x127xf32>
    %117 = vector.extract_strided_slice %90 {offsets = [0, 0], sizes = [8, 1], strides = [1, 1]} : vector<8x128xf32> to vector<8x1xf32>
    %118 = tpu.concatenate %116, %117 in 1 : vector<8x127xf32>, vector<8x1xf32> -> vector<8x128xf32>
    %119 = vector.extract_strided_slice %90 {offsets = [0, 15], sizes = [8, 113], strides = [1, 1]} : vector<8x128xf32> to vector<8x113xf32>
    %120 = vector.extract_strided_slice %90 {offsets = [0, 0], sizes = [8, 15], strides = [1, 1]} : vector<8x128xf32> to vector<8x15xf32>
    %121 = tpu.concatenate %119, %120 in 1 : vector<8x113xf32>, vector<8x15xf32> -> vector<8x128xf32>
    %c112_i32_44 = arith.constant 112 : i32
    %122 = vector.broadcast %c112_i32_44 : i32 to vector<8x128xi32>
    %123 = arith.cmpi slt, %91, %122 : vector<8x128xi32>
    %cst_45 = arith.constant 0.000000e+00 : f32
    %124 = vector.broadcast %cst_45 : f32 to vector<8x128xf32>
    %125 = arith.select %123, %121, %124 : vector<8x128xi1>, vector<8x128xf32>
    %126 = vector.extract_strided_slice %90 {offsets = [0, 16], sizes = [8, 112], strides = [1, 1]} : vector<8x128xf32> to vector<8x112xf32>
    %127 = vector.extract_strided_slice %90 {offsets = [0, 0], sizes = [8, 16], strides = [1, 1]} : vector<8x128xf32> to vector<8x16xf32>
    %128 = tpu.concatenate %126, %127 in 1 : vector<8x112xf32>, vector<8x16xf32> -> vector<8x128xf32>
    %c112_i32_46 = arith.constant 112 : i32
    %129 = vector.broadcast %c112_i32_46 : i32 to vector<8x128xi32>
    %130 = arith.cmpi slt, %91, %129 : vector<8x128xi32>
    %cst_47 = arith.constant 0.000000e+00 : f32
    %131 = vector.broadcast %cst_47 : f32 to vector<8x128xf32>
    %132 = arith.select %130, %128, %131 : vector<8x128xi1>, vector<8x128xf32>
    %133 = vector.extract_strided_slice %90 {offsets = [0, 17], sizes = [8, 111], strides = [1, 1]} : vector<8x128xf32> to vector<8x111xf32>
    %134 = vector.extract_strided_slice %90 {offsets = [0, 0], sizes = [8, 17], strides = [1, 1]} : vector<8x128xf32> to vector<8x17xf32>
    %135 = tpu.concatenate %133, %134 in 1 : vector<8x111xf32>, vector<8x17xf32> -> vector<8x128xf32>
    %c112_i32_48 = arith.constant 112 : i32
    %136 = vector.broadcast %c112_i32_48 : i32 to vector<8x128xi32>
    %137 = arith.cmpi slt, %91, %136 : vector<8x128xi32>
    %cst_49 = arith.constant 0.000000e+00 : f32
    %138 = vector.broadcast %cst_49 : f32 to vector<8x128xf32>
    %139 = arith.select %137, %135, %138 : vector<8x128xi1>, vector<8x128xf32>
    %140 = tpu.concatenate %98, %105, %112, %115, %90, %118, %125, %132, %139 in 0 : vector<8x128xf32>, vector<8x128xf32>, vector<8x128xf32>, vector<8x128xf32>, vector<8x128xf32>, vector<8x128xf32>, vector<8x128xf32>, vector<8x128xf32>, vector<8x128xf32> -> vector<72x128xf32>
    %141 = arith.truncf %140 : vector<72x128xf32> to vector<72x128xbf16>
    %c0_50 = arith.constant 0 : index
    %c0_51 = arith.constant 0 : index
    %142 = vector.load %arg4[%c0_50, %c0_51] : memref<8x72xbf16, #tpu.memory_space<vmem>>, vector<8x72xbf16>
    %cst_52 = arith.constant dense<0.000000e+00> : vector<8x128xf32>
    %143 = tpu.matmul %142, %141, %cst_52 {dimension_numbers = #tpu.dot_dimension_numbers<[1], [0], [0], [1], [0, 0, 1, 1], [], []>} : vector<8x72xbf16>, vector<72x128xbf16>, vector<8x128xf32> -> vector<8x128xf32>
    %c0_53 = arith.constant 0 : index
    %c0_54 = arith.constant 0 : index
    %144 = vector.load %arg5[%c0_53, %c0_54] : memref<8x1xf32, #tpu.memory_space<vmem>>, vector<8x1xf32>
    %145 = vector.broadcast %144 : vector<8x1xf32> to vector<8x128xf32>
    %146 = arith.addf %143, %145 : vector<8x128xf32>
    %cst_55 = arith.constant 0.000000e+00 : f32
    %147 = vector.broadcast %cst_55 : f32 to vector<8x128xf32>
    %148 = arith.maximumf %146, %147 : vector<8x128xf32>
    %149 = arith.truncf %148 : vector<8x128xf32> to vector<8x128xbf16>
    %c0_56 = arith.constant 0 : index
    %c0_57 = arith.constant 0 : index
    %c0_58 = arith.constant 0 : index
    %150 = vector.load %arg6[%c0_56, %c0_57, %c0_58] : memref<1x8x128xbf16, #tpu.memory_space<vmem>>, vector<1x8x128xbf16>
    %151 = vector.shape_cast %150 : vector<1x8x128xbf16> to vector<8x128xbf16>
    %152 = vector.shape_cast %149 : vector<8x128xbf16> to vector<1x8x128xbf16>
    tpu.vector_store %arg6[%c0_56, %c0_57, %c0_58], %152 {strides = array<i32>} : memref<1x8x128xbf16, #tpu.memory_space<vmem>>, vector<1x8x128xbf16>,
    return
  }
  func.func @transform_0(%arg0: i32) -> (i32, i32, i32, i32, i32) {
    %c0_i32 = arith.constant 0 : i32
    %c0_i32_0 = arith.constant 0 : i32
    %c0_i32_1 = arith.constant 0 : i32
    %c0_i32_2 = arith.constant 0 : i32
    %c0_i32_3 = arith.constant 0 : i32
    return %arg0, %c0_i32, %c0_i32_0, %c0_i32_1, %c0_i32_2 : i32, i32, i32, i32, i32
  }
  func.func @transform_1(%arg0: i32) -> (i32, i32) {
    %c0_i32 = arith.constant 0 : i32
    %c0_i32_0 = arith.constant 0 : i32
    %c0_i32_1 = arith.constant 0 : i32
    return %c0_i32, %c0_i32_0 : i32, i32
  }
  func.func @transform_2(%arg0: i32) -> (i32, i32) {
    %c0_i32 = arith.constant 0 : i32
    %c0_i32_0 = arith.constant 0 : i32
    %c0_i32_1 = arith.constant 0 : i32
    return %c0_i32, %c0_i32_0 : i32, i32
  }
  func.func @transform_3(%arg0: i32) -> (i32, i32) {
    %c0_i32 = arith.constant 0 : i32
    %c0_i32_0 = arith.constant 0 : i32
    %c0_i32_1 = arith.constant 0 : i32
    return %c0_i32, %c0_i32_0 : i32, i32
  }
  func.func @transform_4(%arg0: i32) -> (i32, i32) {
    %c0_i32 = arith.constant 0 : i32
    %c0_i32_0 = arith.constant 0 : i32
    %c0_i32_1 = arith.constant 0 : i32
    return %c0_i32, %c0_i32_0 : i32, i32
  }
  func.func @transform_5(%arg0: i32) -> (i32, i32, i32) {
    %c0_i32 = arith.constant 0 : i32
    %c0_i32_0 = arith.constant 0 : i32
    %c0_i32_1 = arith.constant 0 : i32
    return %arg0, %c0_i32, %c0_i32_0 : i32, i32, i32
  }
}

</mosaic_0001>

<bundles_post_ra>
// kernel: tpu_custom_call.1
= control target key start
LH: loop header
LB: loop body
LE: loop exit
PB: predicated region body
PF: predicated region fallthrough
CT: control target
= control target key end

     0   :  { %10 = vsyncpa [#allocation3], 0  ;;  %s1077_s0 = inlined_call_operand.hbm [shape: bf16[2,2,2,8,128], index: 0, kind: input, shape index: {}]   ;;  %s1078_s1 = inlined_call_operand.vmem [shape: bf16[8,72], index: 1, kind: input, shape index: {}]   ;;  %s1079_s2 = inlined_call_operand.vmem [shape: f32[8,1], index: 2, kind: input, shape index: {}]   ;;  %s1080_s3 = inlined_call_operand.vmem [shape: bf16[8,72], index: 3, kind: input, shape index: {}]   ;;  %s1081_s4 = inlined_call_operand.vmem [shape: f32[8,1], index: 4, kind: input, shape index: {}]   ;;  %s1082_s5 = inlined_call_operand.hbm [shape: bf16[2,8,128], index: 5, kind: output, shape index: {}]  }
   0x1   :  { %12 = vsyncpa [#allocation3 + $0x1], 0 }
   0x2   :  { %13 = vsyncpa [#allocation4], 0 }
   0x3   :  { %15 = vsyncpa [#allocation4 + $0x1], 0  ;;  %s826_s18 = smov 0   ;;  %s828_s19 = smov 0  }
   0x4   :  { %s830_s20 = smov 0   ;;  %s832_s21 = smov 0  }
   0x5 LB: > { %s847_s22 = sadd.s32 4294967295, %s778_s21   ;;  %s541_s23 = sadd.s32 4294967294, %s778_s21   ;;  %s778_s21 = sphi %s832_s21, %s1103_s21   ;;  %s774_s20 = sphi %s830_s20, %s1102_s20   ;;  %s770_s19 = sphi %s828_s19, %s1101_s19   ;;  %s766_s18 = sphi %s826_s18, %s1100_s18  }
   0x6   : > { %s851_s24 = sadd.s32 1, %s778_s21   ;;  %s28_s25 = sadd.s32 1, %s774_s20 }
   0x7   : > { %s25_s26 = ssub.s32 %s778_s21, %s851_s24  ;;  %p35_p0 = scmp.ne.s32.totalorder %s774_s20, %s770_s19 }
   0x8   : > { %p26_p1 = scmp.eq.s32.totalorder %s25_s26, 0  ;;  %p36_p2 = scmp.eq.s32.totalorder %s778_s21, 0 }
   0x9   : > { %p41_p3 = scmp.ne.s32.totalorder %s770_s19, %s766_s18  ;;  %p42_p4 = scmp.eq.s32.totalorder %s847_s22, 0 }
   0xa   : > { %s863_s27 = scalar_select %p26_p1, %s774_s20, %s28_s25  }
   0xb   : > { %p865_p5 = por %p36_p2, %p35_p0  ;;  %p869_p6 = por %p42_p4, %p41_p3 }
   0xc   : > { %p149_p7 = scmp.eq.s32.totalorder %s847_s22, 1  ;;  %p155_p8 = scmp.eq.s32.totalorder %s541_s23, 1 }
   0xd   : > { %p633_p10 = scmp.lt.s32.totalorder %s778_s21, 2  ;;  %s187_s7 = sand.u32 1, %s774_s20  }
   0xe   : > { %p876_p11 = por %p149_p7, %p35_p0  ;;  %p880_p12 = por %p155_p8, %p41_p3 }
   0xf   : > { %s580_s8 = sshll.u32 %s778_s21, 8  ;;  %s544_s9 = sshll.u32 %s187_s7, 4 }
  0x10   : > { %s1086_s30 = scalar_select %p876_p11, 1, 0 }
  0x11   : > { %s1087_s6 = scalar_select %p880_p12, 1, 0 }
  0x12   : > { %s889_s12 = scalar_lea.hbm %s1077_s0, %s580_s8  ;;  %s191_s13 = scalar_lea.vmem [#allocation2], %s544_s9 }
  0x13   : > { %s198_s14 = sshll.u32 %s191_s13, 4  ;;  %p893_p13 = pnand %p633_p10, %p865_p5  ;;  %s897_s14 = int_to_ptr.vmem [resolvable:$true] %s198_s14 }
  0x14   : > { %s899_s16 = scalar_lea.sflag [#allocation3], %s187_s7  ;;  %s682_s17 = scalar_lea.hbm %s889_s12, 256 }
  0x15   : > { %p683_p0 = scmp.ne.s32.totalorder %s889_s12, %s682_s17  ;;  %p684_p1 = pneg %p893_p13 }
  0x16   : > { %s687_s26 = scalar_lea.hbm %s1077_s0, 512  ;;  %p688_p4 = scmp.lt.u32.totalorder %s889_s12, %s1077_s0 }
  0x17   : > { %p685_p2 = pnand %p684_p1, %p683_p0  ;;  %p689_p5 = scmp.lt.u32.totalorder %s687_s26, %s682_s17 }
  0x18   : > { %p691_p8 = scmp.lt.u32.totalorder %s682_s17, %s889_s12 }
  0x19   : > { %p686_p3 = pneg %p685_p2  ;;  %p690_p7 = por %p689_p5, %p688_p4 }
  0x1b   : > { %p692_p10 = por %p691_p8, %p690_p7 }
  0x1d   : > { %p693_p9 = pnand %p692_p10, %p686_p3 }
  0x1f   : > { %696 = shalt.err (!%p693_p9)
}
  0x20   : > { %s697_s7 = scalar_lea.vmem %s897_s14, 256  ;;  %s780_s9 = smov [#allocation2]  }
  0x21   : > { %p698_p0 = scmp.ne.s32.totalorder %s897_s14, %s697_s7  ;;  %s702_s10 = sshll.u32 %s780_s9, 4  ;;  %s703_s10 = int_to_ptr.vmem [resolvable:$false] %s702_s10 }
  0x22   : > { %s704_s11 = scalar_lea.vmem %s703_s10, 512  ;;  %p705_p11 = scmp.lt.s32.totalorder %s897_s14, %s703_s10 }
  0x23   : > { %p700_p2 = pnand %p698_p0, %p684_p1  ;;  %p706_p4 = scmp.lt.s32.totalorder %s704_s11, %s697_s7 }
  0x25   : > { %p701_p12 = pneg %p700_p2  ;;  %p707_p5 = por %p706_p4, %p705_p11 }
  0x27   : > { %p708_p7 = pnand %p707_p5, %p701_p12 }
  0x29   : > { %711 = shalt.err (!%p708_p7)
}
  0x2a   : > { %s781_s13 = smov 64   ;;  %s782_s17 = smov 4  }
  0x2b   : > { %628 = dma.hbm_to_vmem [thread:$0]  (!%p893_p13), %s889_s12, 256, %s897_s14, %s899_s16, %s781_s13, %s781_s13, %s782_s17  }
  0x2c   : > { %p547_p9 = scmp.ge.s32.totalorder %s778_s21, 1  ;;  %p206_p1 = scmp.lt.s32.totalorder %s778_s21, 3 }
  0x2e   : > { %p207_p3 = pnand %p547_p9, %p206_p1 }
  0x2f   : > { %s930_s23 = sand.u32 (!%p207_p3), 1, %s770_s19  }
  0x30   : > { %210 = sbr.rel (%p207_p3) target bundleno = 793 (0x319), region = 40  ;;  %s548_s25 = sshll.u32 (!%p207_p3), %s930_s23, 4 }
  0x31   : > { %s213_s26 = scalar_lea.sflag (!%p207_p3), [#allocation3], %s930_s23  ;;  %s216_s28 = scalar_lea.vmem (!%p207_p3), [#allocation2], %s548_s25 }
  0x37   : > { %757 = dma.done.wait (%p869_p6), %s213_s26, 256  }
  0x38   : > { %759 = vsyncadd (%p869_p6), %s213_s26, 4294967040  ;;  %v259_v0 = vld [vmem:[%s216_s28] sm:$0xf]  ;;  %v550_v1 = vld [vmem:[%s216_s28 + $0x4] sm:$0xf]  ;;  %v783_v3 = vmov 0.0   ;;  %v244_v11 = vlaneseq }
  0x39   : > { %v551_v2 = vld [vmem:[%s216_s28 + $0x8] sm:$0xf]  ;;  %593 = vmatprep.subr.bf16.mxu0 %v783_v3  ;;  %607 = vmatprep.subr.bf16.mxu1 %v783_v3  ;;  %v262_v4 = vmax.bf16 %v550_v1, %v259_v0  ;;  %v552_v5 = vld [vmem:[%s216_s28 + $0xc] sm:$0xf]  ;;  %s784_s12 = smov 15   ;;  %s785_s14 = smov 17  }
  0x3a   : > { %v267_v6 = vmax.bf16 %v552_v5, %v551_v2  ;;  %s786_s29 = smov 1   ;;  %s787_s15 = smov 16   ;;  %vm790_vm0 = vmmov 0   ;;  %v793_v9 = vmov 0   ;;  %v309_v10 = vld [vmem:[%s1079_s2] sm:$0xff]  ;;  %v953_v12 = vand.u32 127, %v244_v11 }
  0x3b   : > { %s788_s16 = smov 127   ;;  %s789_s8 = smov 113   ;;  %603 = vmatprep.mubr.msk.bf16.mxu0 %vm790_vm0, %v783_v3  ;;  %617 = vmatprep.mubr.msk.bf16.mxu1 %vm790_vm0, %v783_v3  ;;  %vm794_vm3 = vmmov 1   ;;  %vm319_vm7 = vcmask 1043456   ;;  %v308_v31 = vld [vmem:[%s1078_s1] sm:$0xf] }
  0x3c   : > { %v268_v7 = vmax.bf16 %v267_v6, %v262_v4  ;;  %s791_s7 = smov 112   ;;  %s792_s9 = smov 111   ;;  %681 = vset.pattern.permute.xlu0 %v793_v9  ;;  %vm274_vm1 = vcmp.ge.s32.totalorder %v953_v12, 16  ;;  %vm293_vm5 = vcmp.lt.s32.totalorder %v953_v12, 112  ;;  %vm315_vm8 = vcmask 588800   ;;  %v402_v42 = vld [vmem:[%s1081_s4] sm:$0xff] }
  0x3d   : > { %vm956_vm2 = vmpackc.low %vm274_vm1, %vm274_vm1  ;;  %v250_v32 = vand.u32 15, %v953_v12  ;;  %v401_v58 = vld [vmem:[%s1080_s3] sm:$0xf]  ;;  %s458_s10 = scalar_lea.sflag [#allocation4], %s930_s23  ;;  %p1097_p11 = scmp.ne.s32.totalorder %s1086_s30, 0 }
  0x3e   : > { %v269_v8 = vunpack.c.l.bf16 %v268_v7  ;;  %vm964_vm4 = vmpackc.low %vm794_vm3, %vm274_vm1 }
  0x3f   : > { %vm978_vm6 = vmpackc.low %vm293_vm5, %vm293_vm5  ;;  %vm991_vm9 = vcmp.lt.s32.totalorder %v250_v32, 8 }
  0x40   : > { %280 = vrot.lane.b32.xlu1 %v269_v8, %s784_s12  ;;  %271 = vrot.lane.b32.xlu0 %v269_v8, %s785_s14  ;;  %vm569_vm10 = vmpackc.low %vm794_vm3, %vm991_vm9 }
  0x44   : > { %284 = vrot.lane.b32.xlu1 %v269_v8, %s786_s29  ;;  %276 = vrot.lane.b32.xlu0 %v269_v8, %s787_s15 }
  0x48   : > { %287 = vrot.lane.b32.xlu0 %v269_v8, %s788_s16  ;;  %290 = vrot.lane.b32.xlu1 %v269_v8, %s789_s8 }
  0x4c   : > { %295 = vrot.lane.b32.xlu0 %v269_v8, %s791_s7  ;;  %299 = vrot.lane.b32.xlu1 %v269_v8, %s792_s9 }
  0x50   : > { %312 = vperm.xlu0 %681, %v309_v10  }
  0xb2   : > { %v281_v13 = vpop.permute.xlu1 %280  ;;  %v272_v14 = vpop.permute.xlu0 %271 }
  0xb6   : > { %v285_v15 = vpop.permute.xlu1 %284  ;;  %v277_v16 = vpop.permute.xlu0 %276 }
  0xb7   : > { %v554_v18 = vpack.c.bf16 %v277_v16, %v272_v14  ;;  %v557_v22 = vpack.c.bf16 %v285_v15, %v281_v13 }
  0xb9   : > { %594 = vmatpush3.bf16.msk.msra.mxu0 %vm956_vm2, %v554_v18 }
  0xba   : > { %595 = vmatprep.subr.bf16.mxu0 %v783_v3  ;;  %v288_v19 = vpop.permute.xlu0 %287  ;;  %v291_v21 = vpop.permute.xlu1 %290 }
  0xbb   : > { %v305_v23 = vpack.c.bf16 %v288_v19, %v269_v8 }
  0xbd   : > { %596 = vmatpush3.bf16.msk.msra.mxu0 %vm964_vm4, %v557_v22 }
  0xbe   : > { %597 = vmatprep.subr.bf16.mxu0 %v783_v3  ;;  %v300_v24 = vpop.permute.xlu1 %299  ;;  %v296_v26 = vpop.permute.xlu0 %295 }
  0xbf   : > { %v302_v25 = vsel %vm293_vm5, %v300_v24, 0.0  ;;  %v560_v29 = vpack.c.bf16 %v296_v26, %v291_v21 }
  0xc0   : > { %v307_v27 = vpack.c.bf16 %v302_v25, %v302_v25 }
  0xc1   : > { %598 = vmatpush3.bf16.msra.mxu0 %v305_v23 }
  0xc2   : > { %599 = vmatprep.subr.bf16.mxu0 %v783_v3  ;;  %v321_v30 = vsel %vm319_vm7, %v307_v27, 0 }
  0xc5   : > { %600 = vmatpush3.bf16.msk.msra.mxu0 %vm978_vm6, %v560_v29 }
  0xc6   : > { %601 = vmatprep.subr.bf16.mxu0 %v783_v3 }
  0xc9   : > { %602 = vmatpush3.bf16.msra.mxu0 %v321_v30 }
  0xcc   : > { %604 = vmatmul.mubr.msk.bf16.vlgmr.msra.gmra.mrb[0].mxu0 %vm315_vm8, %v308_v31 }
  0xcf   : > { %v313_v33 = vpop.permute.xlu0 %312 }
 0x19f   : > { %v357_v34 = vpop.f32.mrb[0].mxu0 }
 0x1a0   : > { %v358_v35 = vadd.f32 %v357_v34, %v313_v33  ;;  %v605_v36 = vpop.f32.mrb[1].mxu0 }
 0x1a1   : > { %v360_v38 = vpop.f32.mrb[2].mxu0 }
 0x1a2   : > { %v363_v39 = vmax.f32 %v358_v35, 0.0  ;;  %v606_v40 = vpop.f32.mrb[3].mxu0 }
 0x1a4   : > { %v364_v41 = vsel %vm991_vm9, %v363_v39, 0.0 }
 0x1a5   : > { %374 = vrot.lane.b32.xlu0 %v364_v41, %s784_s12  ;;  %366 = vrot.lane.b32.xlu1 %v364_v41, %s785_s14  ;;  %s549_s14 = sshll.u32 %s930_s23, 2 }
 0x1a9   : > { %381 = vrot.lane.b32.xlu0 %v364_v41, %s788_s16  ;;  %370 = vrot.lane.b32.xlu1 %v364_v41, %s787_s15  ;;  %s242_s15 = scalar_lea.vmem [#allocation5], %s549_s14 }
 0x1aa   : > { %s471_s16 = sshll.u32 %s242_s15, 4  ;;  %s1035_s16 = int_to_ptr.vmem [resolvable:$true] %s471_s16 }
 0x1ab   : > { %s712_s11 = scalar_lea.vmem %s1035_s16, 64 }
 0x1ac   : > { %p713_p6 = scmp.ne.s32.totalorder %s1035_s16, %s712_s11 }
 0x1ad   : > { %388 = vrot.lane.b32.xlu0 %v364_v41, %s791_s7  ;;  %378 = vrot.lane.b32.xlu1 %v364_v41, %s786_s29  ;;  %s577_s29 = sshll.u32 %s847_s22, 6  ;;  %s795_s22 = smov [#allocation5]  }
 0x1ae   : > { %p714_p12 = pnand %p713_p6, %p1097_p11  ;;  %s716_s13 = sshll.u32 %s795_s22, 4  ;;  %s717_s13 = int_to_ptr.vmem [resolvable:$false] %s716_s13 }
 0x1af   : > { %s718_s17 = scalar_lea.vmem %s717_s13, 128  ;;  %p719_p8 = scmp.lt.s32.totalorder %s1035_s16, %s717_s13 }
 0x1b0   : > { %p715_p13 = pneg %p714_p12  ;;  %p720_p10 = scmp.lt.s32.totalorder %s718_s17, %s712_s11 }
 0x1b1   : > { %405 = vperm.xlu0 %681, %v402_v42   ;;  %384 = vrot.lane.b32.xlu1 %v364_v41, %s789_s8 }
 0x1b2   : > { %p721_p0 = por %p720_p10, %p719_p8 }
 0x1b4   : > { %p722_p2 = pnand %p721_p0, %p715_p13 }
 0x1b5   : > { %392 = vrot.lane.b32.xlu1 %v364_v41, %s792_s9  ;;  %s1033_s9 = scalar_lea.hbm %s1082_s5, %s577_s29 }
 0x217   : > { %v367_v43 = vpop.permute.xlu1 %366  ;;  %v375_v44 = vpop.permute.xlu0 %374 }
 0x21b   : > { %v371_v45 = vpop.permute.xlu1 %370  ;;  %v382_v49 = vpop.permute.xlu0 %381 }
 0x21c   : > { %v564_v46 = vpack.c.bf16 %v371_v45, %v367_v43  ;;  %v570_v51 = vpack.c.bf16 %v382_v49, %v363_v39 }
 0x21e   : > { %608 = vmatpush3.bf16.msk.msra.mxu1 %vm956_vm2, %v564_v46 }
 0x21f   : > { %v379_v47 = vpop.permute.xlu1 %378  ;;  %609 = vmatprep.subr.bf16.mxu1 %v783_v3  ;;  %v389_v52 = vpop.permute.xlu0 %388 }
 0x220   : > { %v567_v48 = vpack.c.bf16 %v379_v47, %v375_v44 }
 0x222   : > { %610 = vmatpush3.bf16.msk.msra.mxu1 %vm964_vm4, %v567_v48 }
 0x223   : > { %v385_v50 = vpop.permute.xlu1 %384  ;;  %611 = vmatprep.subr.bf16.mxu1 %v783_v3 }
 0x224   : > { %v573_v54 = vpack.c.bf16 %v389_v52, %v385_v50 }
 0x226   : > { %612 = vmatpush3.bf16.msk.msra.mxu1 %vm569_vm10, %v570_v51 }
 0x227   : > { %v393_v53 = vpop.permute.xlu1 %392  ;;  %613 = vmatprep.subr.bf16.mxu1 %v783_v3 }
 0x228   : > { %v395_v55 = vsel %vm293_vm5, %v393_v53, 0.0 }
 0x229   : > { %v400_v56 = vpack.c.bf16 %v395_v55, %v395_v55 }
 0x22a   : > { %614 = vmatpush3.bf16.msk.msra.mxu1 %vm978_vm6, %v573_v54 }
 0x22b   : > { %615 = vmatprep.subr.bf16.mxu1 %v783_v3  ;;  %v412_v57 = vsel %vm319_vm7, %v400_v56, 0 }
 0x22e   : > { %616 = vmatpush3.bf16.msra.mxu1 %v412_v57 }
 0x230   : > { %v406_v59 = vpop.permute.xlu0 %405 }
 0x231   : > { %618 = vmatmul.mubr.msk.bf16.vlgmr.msra.gmra.mrb[0].mxu1 %vm315_vm8, %v401_v58 }
 0x304   : > { %v448_v60 = vpop.f32.mrb[0].mxu1 }
 0x305   : > { %v449_v61 = vadd.f32 %v448_v60, %v406_v59  ;;  %v619_v62 = vpop.f32.mrb[1].mxu1 }
 0x306   : > { %v451_v63 = vpop.f32.mrb[2].mxu1 }
 0x307   : > { %v454_v0 = vmax.f32 %v449_v61, 0.0  ;;  %v620_v1 = vpop.f32.mrb[3].mxu1 }
 0x309   : > { %v455_v2 = vpack.c.bf16 %v454_v0, %v454_v0 }
 0x30b   : > { %456 = vst [vmem:[%s242_s15] sm:$0xf] %v455_v2 }
 0x30c   : > { %725 = shalt.err (!%p722_p2)
}
 0x30d   : > { %s726_s23 = scalar_lea.hbm %s1033_s9, 64  ;;  %s730_s28 = scalar_lea.hbm %s1082_s5, 128 }
 0x30e   : > { %p727_p4 = scmp.ne.s32.totalorder %s1033_s9, %s726_s23  ;;  %p731_p9 = scmp.lt.u32.totalorder %s1033_s9, %s1082_s5 }
 0x30f   : > { %p732_p1 = scmp.lt.u32.totalorder %s730_s28, %s726_s23  ;;  %p734_p6 = scmp.lt.u32.totalorder %s726_s23, %s1033_s9 }
 0x310   : > { %p728_p5 = pnand %p727_p4, %p1097_p11 }
 0x311   : > { %p733_p3 = por %p732_p1, %p731_p9 }
 0x312   : > { %p729_p7 = pneg %p728_p5 }
 0x313   : > { %p735_p12 = por %p734_p6, %p733_p3 }
 0x315   : > { %p736_p13 = pnand %p735_p12, %p729_p7 }
 0x317   : > { %739 = shalt.err (!%p736_p13)
}
 0x318   : > { %623 = dma.vmem_to_hbm [thread:$0]  (%p1097_p11), %s1035_s16, 64, %s1033_s9, %s458_s10  }
 0x319 PF: > { %s483_s29 = sand.u32 1, %s766_s18   ;;  %p1098_p8 = scmp.ne.s32.totalorder %s1087_s6, 0 }
 0x31a   : > { %p1099_p10 = scmp.ge.s32.totalorder %s778_s21, 2  ;;  %s484_s15 = scalar_lea.sflag [#allocation4], %s483_s29 }
 0x31c   : > { %p630_p0 = pnand %p1099_p10, %p1098_p8 }
 0x31e   : > { %761 = dma.done.wait (!%p630_p0), %s484_s15, 64  }
 0x31f   : > { %763 = vsyncadd (!%p630_p0), %s484_s15, 4294967232  ;;  %p18_p2 = scmp.ge.s32.totalorder %s851_s24, 4   ;;  %s1100_s18 = smov %s770_s19 }
 0x320   : > { %s1101_s19 = smov %s774_s20  ;;  %s1102_s20 = smov %s863_s27 }
 0x321   : > { %s1103_s21 = smov %s851_s24  ;;  %20 = sbr.rel (!%p18_p2) target bundleno = 5 (0x5), region = 88 }
 0x328   :  { %489 = vsyncpa [#allocation3], 1 }
 0x329   :  { %491 = vsyncpa [#allocation3 + $0x1], 1 }
 0x32a   :  { %492 = vsyncpa [#allocation4], 1 }
 0x32b   :  { %494 = vsyncpa [#allocation4 + $0x1], 1 }

</bundles_post_ra>
